<compile_context>
chip_gen: v7x
topology: tpu7x:2x2x1
jax: 0.10.0
libtpu: 0.0.40
codegen_flags: <defaults>
</compile_context>

<pallas_src>
import functools
import math

import jax
import jax.numpy as jnp
from jax import lax
from jax.experimental import pallas as pl
from jax.experimental.pallas import tpu as pltpu


# ----------------------------------------------------------------------------
# Fused single-step kernel:
#   QKV matmul for all B*T rows -> per-(batch, head) causal attention ->
#   per-head accumulation through w_proj row blocks (fused concat + proj).
# ----------------------------------------------------------------------------
def _mha_fused_kernel(x_ref, wqkv_ref, wproj_ref, bproj_ref, o_ref,
                      *, batch: int, seq_len: int, n_head: int, head_size: int):
    T = seq_len
    H = head_size
    D = n_head * H

    x = x_ref[...]                        # (B*T, C)
    w_qkv = wqkv_ref[...]                 # (C, 3D)  [Q heads | K heads | V heads]
    w_p = wproj_ref[...]                  # (D, E)   projection weight, (K, N) layout
    b_p = bproj_ref[...]                  # (1, E)
    E = w_p.shape[1]

    # Single QKV matmul for ALL batch rows and heads: (B*T, C) @ (C, 3D)
    qkv = jnp.dot(x, w_qkv, preferred_element_type=jnp.float32)   # (B*T, 3D)

    scale = H ** (-0.5)
    row = lax.broadcasted_iota(jnp.int32, (T, T), 0)
    col = lax.broadcasted_iota(jnp.int32, (T, T), 1)
    causal = row >= col                   # (T, T), built once, reused for all (b, h)

    for b in range(batch):                                   # static unroll, tiny B
        qkv_b = qkv[b * T:(b + 1) * T, :]                    # (T, 3D) sublane slice
        acc = jnp.zeros((T, E), jnp.float32)
        for h in range(n_head):                              # static unroll, tiny n_head
            q_h = qkv_b[:, h * H:(h + 1) * H]                        # (T, H)
            k_h = qkv_b[:, D + h * H:D + (h + 1) * H]                # (T, H)
            v_h = qkv_b[:, 2 * D + h * H:2 * D + (h + 1) * H]        # (T, H)

            # q @ k^T with the transpose folded into the matmul (no XLU transpose).
            wei = lax.dot_general(
                q_h, k_h,
                dimension_numbers=(((1,), (1,)), ((), ())),
                preferred_element_type=jnp.float32) * scale          # (T, T)
            wei = jnp.where(causal, wei, -1e30)              # finite mask (NaN-safe)
            m = jnp.max(wei, axis=-1, keepdims=True)
            e = jnp.exp(wei - m)
            s = jnp.sum(e, axis=-1, keepdims=True)
            p = e / s                                        # exact softmax

            head_out = jnp.dot(p, v_h, preferred_element_type=jnp.float32)   # (T, H)
            # Fused concat + projection: accumulate through this head's
            # (H, E) row block of w_proj (sublane slice, no lane concat).
            acc = acc + jnp.dot(head_out, w_p[h * H:(h + 1) * H, :],
                                preferred_element_type=jnp.float32)          # (T, E)

        o_ref[b * T:(b + 1) * T, :] = (acc + b_p).astype(o_ref.dtype)


# ----------------------------------------------------------------------------
# One-time weight packing (hoisted out of the per-call path)
# ----------------------------------------------------------------------------
def pack_params(params):
    n_head, H, C = params["wq"].shape
    D = n_head * H

    def to_cat(w):  # (n_head, H, C) -> (C, n_head*H), i.e. x @ result == per-head x @ W^T
        return jnp.transpose(w, (2, 0, 1)).reshape(C, D)

    w_qkv = jnp.concatenate(
        [to_cat(params["wq"]), to_cat(params["wk"]), to_cat(params["wv"])], axis=1)
    return {
        "w_qkv": w_qkv,                           # (C, 3D)
        "w_proj_t": params["w_proj"].T,           # (D, E)   MXU-native (K, N)
        "b_proj": params["b_proj"].reshape(1, -1),  # (1, E)
        "n_head": int(n_head),
        "head_size": int(H),
    }


# ----------------------------------------------------------------------------
# Module wrapper (forward pass)
# ----------------------------------------------------------------------------
def multi_head_attention(x, packed):
    """Forward pass of MultiHeadAttention. x: (B, T, n_embd)."""
    B, T, C = x.shape
    D, E = packed["w_proj_t"].shape
    n_head = packed["n_head"]
    H = packed["head_size"]

    x2d = x.reshape(B * T, C)                     # free (contiguous) reshape

    kernel = functools.partial(_mha_fused_kernel,
                               batch=B, seq_len=T, n_head=n_head, head_size=H)
    vmem = pl.BlockSpec(memory_space=pltpu.MemorySpace.VMEM)
    out2d = pl.pallas_call(
        kernel,
        out_shape=jax.ShapeDtypeStruct((B * T, E), jnp.float32),
        in_specs=[vmem, vmem, vmem, vmem],
        out_specs=vmem,
    )(x2d, packed["w_qkv"], packed["w_proj_t"], packed["b_proj"])
    return out2d.reshape(B, T, E)                 # dropout = identity (eval mode)


def init_params(key, n_embd, n_head, head_size):
    """Deterministic init, mirrors nn.Linear's U(-1/sqrt(fan_in), 1/sqrt(fan_in))."""
    ks = jax.random.split(key, 5)
    bound_qkv = 1.0 / math.sqrt(n_embd)
    d_cat = n_head * head_size
    bound_p = 1.0 / math.sqrt(d_cat)
    return {
        "wq": jax.random.uniform(ks[0], (n_head, head_size, n_embd), jnp.float32,
                                 -bound_qkv, bound_qkv),
        "wk": jax.random.uniform(ks[1], (n_head, head_size, n_embd), jnp.float32,
                                 -bound_qkv, bound_qkv),
        "wv": jax.random.uniform(ks[2], (n_head, head_size, n_embd), jnp.float32,
                                 -bound_qkv, bound_qkv),
        "w_proj": jax.random.uniform(ks[3], (n_embd, d_cat), jnp.float32,
                                     -bound_p, bound_p),
        "b_proj": jax.random.uniform(ks[4], (n_embd,), jnp.float32,
                                     -bound_p, bound_p),
    }


# Pure-JAX reference for correctness check
def _reference(x, params):
    q = jnp.einsum("btc,hdc->bhtd", x, params["wq"])
    k = jnp.einsum("btc,hdc->bhtd", x, params["wk"])
    v = jnp.einsum("btc,hdc->bhtd", x, params["wv"])
    H = q.shape[-1]
    wei = jnp.einsum("bhtd,bhsd->bhts", q, k) * (H ** -0.5)
    T = x.shape[1]
    mask = jnp.tril(jnp.ones((T, T), dtype=bool))
    wei = jnp.where(mask[None, None], wei, -jnp.inf)
    wei = jax.nn.softmax(wei, axis=-1)
    out = jnp.einsum("bhts,bhsd->bhtd", wei, v)
    B, n_head, T, H = out.shape
    cat = jnp.transpose(out, (0, 2, 1, 3)).reshape(B, T, n_head * H)
    return jnp.einsum("btd,ed->bte", cat, params["w_proj"]) + params["b_proj"]


if __name__ == "__main__":
    # hparams: n_embd=32, n_head=4, head_size=8, n_ctx=8, dropout=0.0
    B, T, n_embd, n_head, head_size = 2, 8, 32, 4, 8

    key = jax.random.PRNGKey(0)
    kx, kp = jax.random.split(key)
    x = jax.random.normal(kx, (B, T, n_embd), jnp.float32)
    params = init_params(kp, n_embd, n_head, head_size)

    packed = pack_params(params)            # one-time layout prep at init
    packed = jax.block_until_ready(packed)

    out = multi_head_attention(x, packed)
    out = jax.block_until_ready(out)

    ref = _reference(x, params)
    assert out.shape == (B, T, n_embd)
    # exact-division softmax -> back to tight f32 tolerance
    assert jnp.allclose(out, ref, atol=1e-4, rtol=1e-4), "mismatch vs reference"

    print("KERNEL_OK")
</pallas_src>

<mosaic_0001>
module attributes {stable_mosaic.version = 11 : i64} {
  func.func @_mha_fused_kernel(%arg0: memref<16x32xf32, #tpu.memory_space<vmem>>, %arg1: memref<32x96xf32, #tpu.memory_space<vmem>>, %arg2: memref<32x32xf32, #tpu.memory_space<vmem>>, %arg3: memref<1x32xf32, #tpu.memory_space<vmem>>, %arg4: memref<16x32xf32, #tpu.memory_space<vmem>>) attributes {dimension_semantics = [], scalar_prefetch = 0 : i64, scratch_operands = 0 : i64, tpu.core_type = #tpu.core_type<tc>} {
    %c0 = arith.constant 0 : index
    %c0_0 = arith.constant 0 : index
    %0 = vector.load %arg0[%c0, %c0_0] : memref<16x32xf32, #tpu.memory_space<vmem>>, vector<16x32xf32>
    %c0_1 = arith.constant 0 : index
    %c0_2 = arith.constant 0 : index
    %1 = vector.load %arg1[%c0_1, %c0_2] : memref<32x96xf32, #tpu.memory_space<vmem>>, vector<32x96xf32>
    %c0_3 = arith.constant 0 : index
    %c0_4 = arith.constant 0 : index
    %2 = vector.load %arg2[%c0_3, %c0_4] : memref<32x32xf32, #tpu.memory_space<vmem>>, vector<32x32xf32>
    %c0_5 = arith.constant 0 : index
    %c0_6 = arith.constant 0 : index
    %3 = vector.load %arg3[%c0_5, %c0_6] : memref<1x32xf32, #tpu.memory_space<vmem>>, vector<1x32xf32>
    %cst = arith.constant dense<0.000000e+00> : vector<16x96xf32>
    %4 = tpu.matmul %0, %1, %cst {dimension_numbers = #tpu.dot_dimension_numbers<[1], [0], [0], [1], [0, 0, 1, 1], [], []>} : vector<16x32xf32>, vector<32x96xf32>, vector<16x96xf32> -> vector<16x96xf32>
    %5 = tpu.iota {dimensions = array<i32: 0>} : vector<8x8xi32>
    %6 = tpu.iota {dimensions = array<i32: 1>} : vector<8x8xi32>
    %7 = arith.cmpi sge, %5, %6 : vector<8x8xi32>
    %8 = vector.extract_strided_slice %4 {offsets = [0, 0], sizes = [8, 96], strides = [1, 1]} : vector<16x96xf32> to vector<8x96xf32>
    %cst_7 = arith.constant 0.000000e+00 : f32
    %9 = vector.broadcast %cst_7 : f32 to vector<8x32xf32>
    %10 = vector.extract_strided_slice %8 {offsets = [0, 0], sizes = [8, 8], strides = [1, 1]} : vector<8x96xf32> to vector<8x8xf32>
    %11 = vector.extract_strided_slice %8 {offsets = [0, 32], sizes = [8, 8], strides = [1, 1]} : vector<8x96xf32> to vector<8x8xf32>
    %12 = vector.extract_strided_slice %8 {offsets = [0, 64], sizes = [8, 8], strides = [1, 1]} : vector<8x96xf32> to vector<8x8xf32>
    %cst_8 = arith.constant dense<0.000000e+00> : vector<8x8xf32>
    %13 = tpu.matmul %10, %11, %cst_8 {dimension_numbers = #tpu.dot_dimension_numbers<[1], [1], [0], [0], [0, 0, 1, 0], [], []>} : vector<8x8xf32>, vector<8x8xf32>, vector<8x8xf32> -> vector<8x8xf32>
    %cst_9 = arith.constant 0.353553385 : f32
    %14 = vector.broadcast %cst_9 : f32 to vector<8x8xf32>
    %15 = arith.mulf %13, %14 : vector<8x8xf32>
    %cst_10 = arith.constant -1.000000e+30 : f32
    %16 = vector.broadcast %cst_10 : f32 to vector<8x8xf32>
    %17 = arith.select %7, %15, %16 : vector<8x8xi1>, vector<8x8xf32>
    %cst_11 = arith.constant dense<0xFF800000> : vector<8xf32>
    %18 = vector.multi_reduction <maximumf>, %17, %cst_11 [1] : vector<8x8xf32> to vector<8xf32>
    %19 = vector.shape_cast %18 : vector<8xf32> to vector<8x1xf32>
    %20 = vector.broadcast %19 : vector<8x1xf32> to vector<8x8xf32>
    %21 = arith.subf %17, %20 : vector<8x8xf32>
    %22 = math.exp %21 : vector<8x8xf32>
    %cst_12 = arith.constant dense<0.000000e+00> : vector<8xf32>
    %23 = vector.multi_reduction <add>, %22, %cst_12 [1] : vector<8x8xf32> to vector<8xf32>
    %24 = vector.shape_cast %23 : vector<8xf32> to vector<8x1xf32>
    %25 = vector.broadcast %24 : vector<8x1xf32> to vector<8x8xf32>
    %26 = arith.divf %22, %25 : vector<8x8xf32>
    %cst_13 = arith.constant dense<0.000000e+00> : vector<8x8xf32>
    %27 = tpu.matmul %26, %12, %cst_13 {dimension_numbers = #tpu.dot_dimension_numbers<[1], [0], [0], [1], [0, 0, 1, 1], [], []>} : vector<8x8xf32>, vector<8x8xf32>, vector<8x8xf32> -> vector<8x8xf32>
    %28 = vector.extract_strided_slice %2 {offsets = [0, 0], sizes = [8, 32], strides = [1, 1]} : vector<32x32xf32> to vector<8x32xf32>
    %cst_14 = arith.constant dense<0.000000e+00> : vector<8x32xf32>
    %29 = tpu.matmul %27, %28, %cst_14 {dimension_numbers = #tpu.dot_dimension_numbers<[1], [0], [0], [1], [0, 0, 1, 1], [], []>} : vector<8x8xf32>, vector<8x32xf32>, vector<8x32xf32> -> vector<8x32xf32>
    %30 = arith.addf %9, %29 : vector<8x32xf32>
    %31 = vector.extract_strided_slice %8 {offsets = [0, 8], sizes = [8, 8], strides = [1, 1]} : vector<8x96xf32> to vector<8x8xf32>
    %32 = vector.extract_strided_slice %8 {offsets = [0, 40], sizes = [8, 8], strides = [1, 1]} : vector<8x96xf32> to vector<8x8xf32>
    %33 = vector.extract_strided_slice %8 {offsets = [0, 72], sizes = [8, 8], strides = [1, 1]} : vector<8x96xf32> to vector<8x8xf32>
    %cst_15 = arith.constant dense<0.000000e+00> : vector<8x8xf32>
    %34 = tpu.matmul %31, %32, %cst_15 {dimension_numbers = #tpu.dot_dimension_numbers<[1], [1], [0], [0], [0, 0, 1, 0], [], []>} : vector<8x8xf32>, vector<8x8xf32>, vector<8x8xf32> -> vector<8x8xf32>
    %cst_16 = arith.constant 0.353553385 : f32
    %35 = vector.broadcast %cst_16 : f32 to vector<8x8xf32>
    %36 = arith.mulf %34, %35 : vector<8x8xf32>
    %cst_17 = arith.constant -1.000000e+30 : f32
    %37 = vector.broadcast %cst_17 : f32 to vector<8x8xf32>
    %38 = arith.select %7, %36, %37 : vector<8x8xi1>, vector<8x8xf32>
    %cst_18 = arith.constant dense<0xFF800000> : vector<8xf32>
    %39 = vector.multi_reduction <maximumf>, %38, %cst_18 [1] : vector<8x8xf32> to vector<8xf32>
    %40 = vector.shape_cast %39 : vector<8xf32> to vector<8x1xf32>
    %41 = vector.broadcast %40 : vector<8x1xf32> to vector<8x8xf32>
    %42 = arith.subf %38, %41 : vector<8x8xf32>
    %43 = math.exp %42 : vector<8x8xf32>
    %cst_19 = arith.constant dense<0.000000e+00> : vector<8xf32>
    %44 = vector.multi_reduction <add>, %43, %cst_19 [1] : vector<8x8xf32> to vector<8xf32>
    %45 = vector.shape_cast %44 : vector<8xf32> to vector<8x1xf32>
    %46 = vector.broadcast %45 : vector<8x1xf32> to vector<8x8xf32>
    %47 = arith.divf %43, %46 : vector<8x8xf32>
    %cst_20 = arith.constant dense<0.000000e+00> : vector<8x8xf32>
    %48 = tpu.matmul %47, %33, %cst_20 {dimension_numbers = #tpu.dot_dimension_numbers<[1], [0], [0], [1], [0, 0, 1, 1], [], []>} : vector<8x8xf32>, vector<8x8xf32>, vector<8x8xf32> -> vector<8x8xf32>
    %49 = vector.extract_strided_slice %2 {offsets = [8, 0], sizes = [8, 32], strides = [1, 1]} : vector<32x32xf32> to vector<8x32xf32>
    %cst_21 = arith.constant dense<0.000000e+00> : vector<8x32xf32>
    %50 = tpu.matmul %48, %49, %cst_21 {dimension_numbers = #tpu.dot_dimension_numbers<[1], [0], [0], [1], [0, 0, 1, 1], [], []>} : vector<8x8xf32>, vector<8x32xf32>, vector<8x32xf32> -> vector<8x32xf32>
    %51 = arith.addf %30, %50 : vector<8x32xf32>
    %52 = vector.extract_strided_slice %8 {offsets = [0, 16], sizes = [8, 8], strides = [1, 1]} : vector<8x96xf32> to vector<8x8xf32>
    %53 = vector.extract_strided_slice %8 {offsets = [0, 48], sizes = [8, 8], strides = [1, 1]} : vector<8x96xf32> to vector<8x8xf32>
    %54 = vector.extract_strided_slice %8 {offsets = [0, 80], sizes = [8, 8], strides = [1, 1]} : vector<8x96xf32> to vector<8x8xf32>
    %cst_22 = arith.constant dense<0.000000e+00> : vector<8x8xf32>
    %55 = tpu.matmul %52, %53, %cst_22 {dimension_numbers = #tpu.dot_dimension_numbers<[1], [1], [0], [0], [0, 0, 1, 0], [], []>} : vector<8x8xf32>, vector<8x8xf32>, vector<8x8xf32> -> vector<8x8xf32>
    %cst_23 = arith.constant 0.353553385 : f32
    %56 = vector.broadcast %cst_23 : f32 to vector<8x8xf32>
    %57 = arith.mulf %55, %56 : vector<8x8xf32>
    %cst_24 = arith.constant -1.000000e+30 : f32
    %58 = vector.broadcast %cst_24 : f32 to vector<8x8xf32>
    %59 = arith.select %7, %57, %58 : vector<8x8xi1>, vector<8x8xf32>
    %cst_25 = arith.constant dense<0xFF800000> : vector<8xf32>
    %60 = vector.multi_reduction <maximumf>, %59, %cst_25 [1] : vector<8x8xf32> to vector<8xf32>
    %61 = vector.shape_cast %60 : vector<8xf32> to vector<8x1xf32>
    %62 = vector.broadcast %61 : vector<8x1xf32> to vector<8x8xf32>
    %63 = arith.subf %59, %62 : vector<8x8xf32>
    %64 = math.exp %63 : vector<8x8xf32>
    %cst_26 = arith.constant dense<0.000000e+00> : vector<8xf32>
    %65 = vector.multi_reduction <add>, %64, %cst_26 [1] : vector<8x8xf32> to vector<8xf32>
    %66 = vector.shape_cast %65 : vector<8xf32> to vector<8x1xf32>
    %67 = vector.broadcast %66 : vector<8x1xf32> to vector<8x8xf32>
    %68 = arith.divf %64, %67 : vector<8x8xf32>
    %cst_27 = arith.constant dense<0.000000e+00> : vector<8x8xf32>
    %69 = tpu.matmul %68, %54, %cst_27 {dimension_numbers = #tpu.dot_dimension_numbers<[1], [0], [0], [1], [0, 0, 1, 1], [], []>} : vector<8x8xf32>, vector<8x8xf32>, vector<8x8xf32> -> vector<8x8xf32>
    %70 = vector.extract_strided_slice %2 {offsets = [16, 0], sizes = [8, 32], strides = [1, 1]} : vector<32x32xf32> to vector<8x32xf32>
    %cst_28 = arith.constant dense<0.000000e+00> : vector<8x32xf32>
    %71 = tpu.matmul %69, %70, %cst_28 {dimension_numbers = #tpu.dot_dimension_numbers<[1], [0], [0], [1], [0, 0, 1, 1], [], []>} : vector<8x8xf32>, vector<8x32xf32>, vector<8x32xf32> -> vector<8x32xf32>
    %72 = arith.addf %51, %71 : vector<8x32xf32>
    %73 = vector.extract_strided_slice %8 {offsets = [0, 24], sizes = [8, 8], strides = [1, 1]} : vector<8x96xf32> to vector<8x8xf32>
    %74 = vector.extract_strided_slice %8 {offsets = [0, 56], sizes = [8, 8], strides = [1, 1]} : vector<8x96xf32> to vector<8x8xf32>
    %75 = vector.extract_strided_slice %8 {offsets = [0, 88], sizes = [8, 8], strides = [1, 1]} : vector<8x96xf32> to vector<8x8xf32>
    %cst_29 = arith.constant dense<0.000000e+00> : vector<8x8xf32>
    %76 = tpu.matmul %73, %74, %cst_29 {dimension_numbers = #tpu.dot_dimension_numbers<[1], [1], [0], [0], [0, 0, 1, 0], [], []>} : vector<8x8xf32>, vector<8x8xf32>, vector<8x8xf32> -> vector<8x8xf32>
    %cst_30 = arith.constant 0.353553385 : f32
    %77 = vector.broadcast %cst_30 : f32 to vector<8x8xf32>
    %78 = arith.mulf %76, %77 : vector<8x8xf32>
    %cst_31 = arith.constant -1.000000e+30 : f32
    %79 = vector.broadcast %cst_31 : f32 to vector<8x8xf32>
    %80 = arith.select %7, %78, %79 : vector<8x8xi1>, vector<8x8xf32>
    %cst_32 = arith.constant dense<0xFF800000> : vector<8xf32>
    %81 = vector.multi_reduction <maximumf>, %80, %cst_32 [1] : vector<8x8xf32> to vector<8xf32>
    %82 = vector.shape_cast %81 : vector<8xf32> to vector<8x1xf32>
    %83 = vector.broadcast %82 : vector<8x1xf32> to vector<8x8xf32>
    %84 = arith.subf %80, %83 : vector<8x8xf32>
    %85 = math.exp %84 : vector<8x8xf32>
    %cst_33 = arith.constant dense<0.000000e+00> : vector<8xf32>
    %86 = vector.multi_reduction <add>, %85, %cst_33 [1] : vector<8x8xf32> to vector<8xf32>
    %87 = vector.shape_cast %86 : vector<8xf32> to vector<8x1xf32>
    %88 = vector.broadcast %87 : vector<8x1xf32> to vector<8x8xf32>
    %89 = arith.divf %85, %88 : vector<8x8xf32>
    %cst_34 = arith.constant dense<0.000000e+00> : vector<8x8xf32>
    %90 = tpu.matmul %89, %75, %cst_34 {dimension_numbers = #tpu.dot_dimension_numbers<[1], [0], [0], [1], [0, 0, 1, 1], [], []>} : vector<8x8xf32>, vector<8x8xf32>, vector<8x8xf32> -> vector<8x8xf32>
    %91 = vector.extract_strided_slice %2 {offsets = [24, 0], sizes = [8, 32], strides = [1, 1]} : vector<32x32xf32> to vector<8x32xf32>
    %cst_35 = arith.constant dense<0.000000e+00> : vector<8x32xf32>
    %92 = tpu.matmul %90, %91, %cst_35 {dimension_numbers = #tpu.dot_dimension_numbers<[1], [0], [0], [1], [0, 0, 1, 1], [], []>} : vector<8x8xf32>, vector<8x32xf32>, vector<8x32xf32> -> vector<8x32xf32>
    %93 = arith.addf %72, %92 : vector<8x32xf32>
    %94 = vector.broadcast %3 : vector<1x32xf32> to vector<8x32xf32>
    %95 = arith.addf %93, %94 : vector<8x32xf32>
    %c0_36 = arith.constant 0 : index
    %c0_37 = arith.constant 0 : index
    %96 = vector.load %arg4[%c0_36, %c0_37] : memref<16x32xf32, #tpu.memory_space<vmem>>, vector<8x32xf32>
    tpu.vector_store %arg4[%c0_36, %c0_37], %95 {strides = array<i32>} : memref<16x32xf32, #tpu.memory_space<vmem>>, vector<8x32xf32>,
    %97 = vector.extract_strided_slice %4 {offsets = [8, 0], sizes = [8, 96], strides = [1, 1]} : vector<16x96xf32> to vector<8x96xf32>
    %cst_38 = arith.constant 0.000000e+00 : f32
    %98 = vector.broadcast %cst_38 : f32 to vector<8x32xf32>
    %99 = vector.extract_strided_slice %97 {offsets = [0, 0], sizes = [8, 8], strides = [1, 1]} : vector<8x96xf32> to vector<8x8xf32>
    %100 = vector.extract_strided_slice %97 {offsets = [0, 32], sizes = [8, 8], strides = [1, 1]} : vector<8x96xf32> to vector<8x8xf32>
    %101 = vector.extract_strided_slice %97 {offsets = [0, 64], sizes = [8, 8], strides = [1, 1]} : vector<8x96xf32> to vector<8x8xf32>
    %cst_39 = arith.constant dense<0.000000e+00> : vector<8x8xf32>
    %102 = tpu.matmul %99, %100, %cst_39 {dimension_numbers = #tpu.dot_dimension_numbers<[1], [1], [0], [0], [0, 0, 1, 0], [], []>} : vector<8x8xf32>, vector<8x8xf32>, vector<8x8xf32> -> vector<8x8xf32>
    %cst_40 = arith.constant 0.353553385 : f32
    %103 = vector.broadcast %cst_40 : f32 to vector<8x8xf32>
    %104 = arith.mulf %102, %103 : vector<8x8xf32>
    %cst_41 = arith.constant -1.000000e+30 : f32
    %105 = vector.broadcast %cst_41 : f32 to vector<8x8xf32>
    %106 = arith.select %7, %104, %105 : vector<8x8xi1>, vector<8x8xf32>
    %cst_42 = arith.constant dense<0xFF800000> : vector<8xf32>
    %107 = vector.multi_reduction <maximumf>, %106, %cst_42 [1] : vector<8x8xf32> to vector<8xf32>
    %108 = vector.shape_cast %107 : vector<8xf32> to vector<8x1xf32>
    %109 = vector.broadcast %108 : vector<8x1xf32> to vector<8x8xf32>
    %110 = arith.subf %106, %109 : vector<8x8xf32>
    %111 = math.exp %110 : vector<8x8xf32>
    %cst_43 = arith.constant dense<0.000000e+00> : vector<8xf32>
    %112 = vector.multi_reduction <add>, %111, %cst_43 [1] : vector<8x8xf32> to vector<8xf32>
    %113 = vector.shape_cast %112 : vector<8xf32> to vector<8x1xf32>
    %114 = vector.broadcast %113 : vector<8x1xf32> to vector<8x8xf32>
    %115 = arith.divf %111, %114 : vector<8x8xf32>
    %cst_44 = arith.constant dense<0.000000e+00> : vector<8x8xf32>
    %116 = tpu.matmul %115, %101, %cst_44 {dimension_numbers = #tpu.dot_dimension_numbers<[1], [0], [0], [1], [0, 0, 1, 1], [], []>} : vector<8x8xf32>, vector<8x8xf32>, vector<8x8xf32> -> vector<8x8xf32>
    %117 = vector.extract_strided_slice %2 {offsets = [0, 0], sizes = [8, 32], strides = [1, 1]} : vector<32x32xf32> to vector<8x32xf32>
    %cst_45 = arith.constant dense<0.000000e+00> : vector<8x32xf32>
    %118 = tpu.matmul %116, %117, %cst_45 {dimension_numbers = #tpu.dot_dimension_numbers<[1], [0], [0], [1], [0, 0, 1, 1], [], []>} : vector<8x8xf32>, vector<8x32xf32>, vector<8x32xf32> -> vector<8x32xf32>
    %119 = arith.addf %98, %118 : vector<8x32xf32>
    %120 = vector.extract_strided_slice %97 {offsets = [0, 8], sizes = [8, 8], strides = [1, 1]} : vector<8x96xf32> to vector<8x8xf32>
    %121 = vector.extract_strided_slice %97 {offsets = [0, 40], sizes = [8, 8], strides = [1, 1]} : vector<8x96xf32> to vector<8x8xf32>
    %122 = vector.extract_strided_slice %97 {offsets = [0, 72], sizes = [8, 8], strides = [1, 1]} : vector<8x96xf32> to vector<8x8xf32>
    %cst_46 = arith.constant dense<0.000000e+00> : vector<8x8xf32>
    %123 = tpu.matmul %120, %121, %cst_46 {dimension_numbers = #tpu.dot_dimension_numbers<[1], [1], [0], [0], [0, 0, 1, 0], [], []>} : vector<8x8xf32>, vector<8x8xf32>, vector<8x8xf32> -> vector<8x8xf32>
    %cst_47 = arith.constant 0.353553385 : f32
    %124 = vector.broadcast %cst_47 : f32 to vector<8x8xf32>
    %125 = arith.mulf %123, %124 : vector<8x8xf32>
    %cst_48 = arith.constant -1.000000e+30 : f32
    %126 = vector.broadcast %cst_48 : f32 to vector<8x8xf32>
    %127 = arith.select %7, %125, %126 : vector<8x8xi1>, vector<8x8xf32>
    %cst_49 = arith.constant dense<0xFF800000> : vector<8xf32>
    %128 = vector.multi_reduction <maximumf>, %127, %cst_49 [1] : vector<8x8xf32> to vector<8xf32>
    %129 = vector.shape_cast %128 : vector<8xf32> to vector<8x1xf32>
    %130 = vector.broadcast %129 : vector<8x1xf32> to vector<8x8xf32>
    %131 = arith.subf %127, %130 : vector<8x8xf32>
    %132 = math.exp %131 : vector<8x8xf32>
    %cst_50 = arith.constant dense<0.000000e+00> : vector<8xf32>
    %133 = vector.multi_reduction <add>, %132, %cst_50 [1] : vector<8x8xf32> to vector<8xf32>
    %134 = vector.shape_cast %133 : vector<8xf32> to vector<8x1xf32>
    %135 = vector.broadcast %134 : vector<8x1xf32> to vector<8x8xf32>
    %136 = arith.divf %132, %135 : vector<8x8xf32>
    %cst_51 = arith.constant dense<0.000000e+00> : vector<8x8xf32>
    %137 = tpu.matmul %136, %122, %cst_51 {dimension_numbers = #tpu.dot_dimension_numbers<[1], [0], [0], [1], [0, 0, 1, 1], [], []>} : vector<8x8xf32>, vector<8x8xf32>, vector<8x8xf32> -> vector<8x8xf32>
    %138 = vector.extract_strided_slice %2 {offsets = [8, 0], sizes = [8, 32], strides = [1, 1]} : vector<32x32xf32> to vector<8x32xf32>
    %cst_52 = arith.constant dense<0.000000e+00> : vector<8x32xf32>
    %139 = tpu.matmul %137, %138, %cst_52 {dimension_numbers = #tpu.dot_dimension_numbers<[1], [0], [0], [1], [0, 0, 1, 1], [], []>} : vector<8x8xf32>, vector<8x32xf32>, vector<8x32xf32> -> vector<8x32xf32>
    %140 = arith.addf %119, %139 : vector<8x32xf32>
    %141 = vector.extract_strided_slice %97 {offsets = [0, 16], sizes = [8, 8], strides = [1, 1]} : vector<8x96xf32> to vector<8x8xf32>
    %142 = vector.extract_strided_slice %97 {offsets = [0, 48], sizes = [8, 8], strides = [1, 1]} : vector<8x96xf32> to vector<8x8xf32>
    %143 = vector.extract_strided_slice %97 {offsets = [0, 80], sizes = [8, 8], strides = [1, 1]} : vector<8x96xf32> to vector<8x8xf32>
    %cst_53 = arith.constant dense<0.000000e+00> : vector<8x8xf32>
    %144 = tpu.matmul %141, %142, %cst_53 {dimension_numbers = #tpu.dot_dimension_numbers<[1], [1], [0], [0], [0, 0, 1, 0], [], []>} : vector<8x8xf32>, vector<8x8xf32>, vector<8x8xf32> -> vector<8x8xf32>
    %cst_54 = arith.constant 0.353553385 : f32
    %145 = vector.broadcast %cst_54 : f32 to vector<8x8xf32>
    %146 = arith.mulf %144, %145 : vector<8x8xf32>
    %cst_55 = arith.constant -1.000000e+30 : f32
    %147 = vector.broadcast %cst_55 : f32 to vector<8x8xf32>
    %148 = arith.select %7, %146, %147 : vector<8x8xi1>, vector<8x8xf32>
    %cst_56 = arith.constant dense<0xFF800000> : vector<8xf32>
    %149 = vector.multi_reduction <maximumf>, %148, %cst_56 [1] : vector<8x8xf32> to vector<8xf32>
    %150 = vector.shape_cast %149 : vector<8xf32> to vector<8x1xf32>
    %151 = vector.broadcast %150 : vector<8x1xf32> to vector<8x8xf32>
    %152 = arith.subf %148, %151 : vector<8x8xf32>
    %153 = math.exp %152 : vector<8x8xf32>
    %cst_57 = arith.constant dense<0.000000e+00> : vector<8xf32>
    %154 = vector.multi_reduction <add>, %153, %cst_57 [1] : vector<8x8xf32> to vector<8xf32>
    %155 = vector.shape_cast %154 : vector<8xf32> to vector<8x1xf32>
    %156 = vector.broadcast %155 : vector<8x1xf32> to vector<8x8xf32>
    %157 = arith.divf %153, %156 : vector<8x8xf32>
    %cst_58 = arith.constant dense<0.000000e+00> : vector<8x8xf32>
    %158 = tpu.matmul %157, %143, %cst_58 {dimension_numbers = #tpu.dot_dimension_numbers<[1], [0], [0], [1], [0, 0, 1, 1], [], []>} : vector<8x8xf32>, vector<8x8xf32>, vector<8x8xf32> -> vector<8x8xf32>
    %159 = vector.extract_strided_slice %2 {offsets = [16, 0], sizes = [8, 32], strides = [1, 1]} : vector<32x32xf32> to vector<8x32xf32>
    %cst_59 = arith.constant dense<0.000000e+00> : vector<8x32xf32>
    %160 = tpu.matmul %158, %159, %cst_59 {dimension_numbers = #tpu.dot_dimension_numbers<[1], [0], [0], [1], [0, 0, 1, 1], [], []>} : vector<8x8xf32>, vector<8x32xf32>, vector<8x32xf32> -> vector<8x32xf32>
    %161 = arith.addf %140, %160 : vector<8x32xf32>
    %162 = vector.extract_strided_slice %97 {offsets = [0, 24], sizes = [8, 8], strides = [1, 1]} : vector<8x96xf32> to vector<8x8xf32>
    %163 = vector.extract_strided_slice %97 {offsets = [0, 56], sizes = [8, 8], strides = [1, 1]} : vector<8x96xf32> to vector<8x8xf32>
    %164 = vector.extract_strided_slice %97 {offsets = [0, 88], sizes = [8, 8], strides = [1, 1]} : vector<8x96xf32> to vector<8x8xf32>
    %cst_60 = arith.constant dense<0.000000e+00> : vector<8x8xf32>
    %165 = tpu.matmul %162, %163, %cst_60 {dimension_numbers = #tpu.dot_dimension_numbers<[1], [1], [0], [0], [0, 0, 1, 0], [], []>} : vector<8x8xf32>, vector<8x8xf32>, vector<8x8xf32> -> vector<8x8xf32>
    %cst_61 = arith.constant 0.353553385 : f32
    %166 = vector.broadcast %cst_61 : f32 to vector<8x8xf32>
    %167 = arith.mulf %165, %166 : vector<8x8xf32>
    %cst_62 = arith.constant -1.000000e+30 : f32
    %168 = vector.broadcast %cst_62 : f32 to vector<8x8xf32>
    %169 = arith.select %7, %167, %168 : vector<8x8xi1>, vector<8x8xf32>
    %cst_63 = arith.constant dense<0xFF800000> : vector<8xf32>
    %170 = vector.multi_reduction <maximumf>, %169, %cst_63 [1] : vector<8x8xf32> to vector<8xf32>
    %171 = vector.shape_cast %170 : vector<8xf32> to vector<8x1xf32>
    %172 = vector.broadcast %171 : vector<8x1xf32> to vector<8x8xf32>
    %173 = arith.subf %169, %172 : vector<8x8xf32>
    %174 = math.exp %173 : vector<8x8xf32>
    %cst_64 = arith.constant dense<0.000000e+00> : vector<8xf32>
    %175 = vector.multi_reduction <add>, %174, %cst_64 [1] : vector<8x8xf32> to vector<8xf32>
    %176 = vector.shape_cast %175 : vector<8xf32> to vector<8x1xf32>
    %177 = vector.broadcast %176 : vector<8x1xf32> to vector<8x8xf32>
    %178 = arith.divf %174, %177 : vector<8x8xf32>
    %cst_65 = arith.constant dense<0.000000e+00> : vector<8x8xf32>
    %179 = tpu.matmul %178, %164, %cst_65 {dimension_numbers = #tpu.dot_dimension_numbers<[1], [0], [0], [1], [0, 0, 1, 1], [], []>} : vector<8x8xf32>, vector<8x8xf32>, vector<8x8xf32> -> vector<8x8xf32>
    %180 = vector.extract_strided_slice %2 {offsets = [24, 0], sizes = [8, 32], strides = [1, 1]} : vector<32x32xf32> to vector<8x32xf32>
    %cst_66 = arith.constant dense<0.000000e+00> : vector<8x32xf32>
    %181 = tpu.matmul %179, %180, %cst_66 {dimension_numbers = #tpu.dot_dimension_numbers<[1], [0], [0], [1], [0, 0, 1, 1], [], []>} : vector<8x8xf32>, vector<8x32xf32>, vector<8x32xf32> -> vector<8x32xf32>
    %182 = arith.addf %161, %181 : vector<8x32xf32>
    %183 = vector.broadcast %3 : vector<1x32xf32> to vector<8x32xf32>
    %184 = arith.addf %182, %183 : vector<8x32xf32>
    %c8 = arith.constant 8 : index
    %c0_67 = arith.constant 0 : index
    %185 = vector.load %arg4[%c8, %c0_67] : memref<16x32xf32, #tpu.memory_space<vmem>>, vector<8x32xf32>
    tpu.vector_store %arg4[%c8, %c0_67], %184 {strides = array<i32>} : memref<16x32xf32, #tpu.memory_space<vmem>>, vector<8x32xf32>,
    return
  }
}

</mosaic_0001>

<bundles_post_ra>
// kernel: tpu_custom_call.1
= control target key start
LH: loop header
LB: loop body
LE: loop exit
PB: predicated region body
PF: predicated region fallthrough
CT: control target
= control target key end

     0   :  { %9 = vsyncpa [#allocation3], 0  ;;  %s2815_s0 = inlined_call_operand.hbm [shape: f32[16,32], index: 0, kind: input, shape index: {}]   ;;  %s2816_s1 = inlined_call_operand.hbm [shape: f32[32,96], index: 1, kind: input, shape index: {}]   ;;  %s2817_s2 = inlined_call_operand.hbm [shape: f32[32,32], index: 2, kind: input, shape index: {}]   ;;  %s2818_s3 = inlined_call_operand.vmem [shape: f32[1,32], index: 3, kind: input, shape index: {}]   ;;  %s2819_s4 = inlined_call_operand.hbm [shape: f32[16,32], index: 4, kind: output, shape index: {}]  }
   0x1   :  { %10 = vsyncpa [#allocation6], 0 }
   0x2   :  { %11 = vsyncpa [#allocation4], 0  ;;  %s2481_s15 = smov [#allocation5]   ;;  %s2482_s17 = smov [#allocation2]  }
   0x3   :  { %s29_s16 = sshll.u32 %s2481_s15, 4  ;;  %s17_s18 = sshll.u32 %s2482_s17, 4  ;;  %s30_s16 = int_to_ptr.vmem [resolvable:$true] %s29_s16  ;;  %s2525_s18 = int_to_ptr.vmem [resolvable:$true] %s17_s18 }
   0x4   :  { %s2387_s21 = scalar_lea.hbm %s2816_s1, 512 }
   0x5   :  { %p2388_p0 = scmp.ne.s32.totalorder %s2816_s1, %s2387_s21  ;;  %p2391_p1 = scmp.lt.u32.totalorder %s2387_s21, %s2816_s1 }
   0x7   :  { %p2393_p2 = pnand %p2391_p1, %p2388_p0 }
   0x9   :  { %2396 = shalt.err (!%p2393_p2)
}
   0xa   :  { %s2397_s26 = scalar_lea.vmem %s30_s16, 512  ;;  %p2402_p4 = scmp.lt.s32.totalorder %s30_s16, %s30_s16 }
   0xb   :  { %p2398_p3 = scmp.ne.s32.totalorder %s30_s16, %s2397_s26  ;;  %p2403_p5 = scmp.lt.s32.totalorder %s2397_s26, %s2397_s26 }
   0xd   :  { %p2404_p6 = por %p2403_p5, %p2402_p4 }
   0xf   :  { %p2405_p7 = pnand %p2404_p6, %p2398_p3 }
  0x11   :  { %2408 = shalt.err (!%p2405_p7)
}
  0x12   :  { %s2483_s27 = smov 128   ;;  %s2484_s28 = smov 8  }
  0x13   :  { %35 = dma.hbm_to_vmem [thread:$0]  %s2816_s1, 512, %s30_s16, [#allocation6], %s2483_s27, %s2483_s27, %s2484_s28  }
  0x14   :  { %s2409_s7 = scalar_lea.hbm %s2815_s0, 256 }
  0x15   :  { %p2410_p8 = scmp.ne.s32.totalorder %s2815_s0, %s2409_s7  ;;  %p2413_p9 = scmp.lt.u32.totalorder %s2409_s7, %s2815_s0 }
  0x17   :  { %p2415_p10 = pnand %p2413_p9, %p2410_p8 }
  0x19   :  { %2418 = shalt.err (!%p2415_p10)
}
  0x1a   :  { %s2419_s12 = scalar_lea.vmem %s2525_s18, 256  ;;  %p2424_p12 = scmp.lt.s32.totalorder %s2525_s18, %s2525_s18 }
  0x1b   :  { %p2420_p11 = scmp.ne.s32.totalorder %s2525_s18, %s2419_s12  ;;  %p2425_p13 = scmp.lt.s32.totalorder %s2419_s12, %s2419_s12 }
  0x1d   :  { %p2426_p0 = por %p2425_p13, %p2424_p12 }
  0x1f   :  { %p2427_p1 = pnand %p2426_p0, %p2420_p11 }
  0x21   :  { %2430 = shalt.err (!%p2427_p1)
}
  0x22   :  { %23 = dma.hbm_to_vmem [thread:$0]  %s2815_s0, 256, %s2525_s18, [#allocation3], %s2483_s27, %s2483_s27, %s2484_s28  }
  0x23   :  { %s2485_s14 = smov [#allocation7]   ;;  %s2431_s19 = scalar_lea.hbm %s2817_s2, 512 }
  0x24   :  { %s41_s15 = sshll.u32 %s2485_s14, 4  ;;  %p2432_p2 = scmp.ne.s32.totalorder %s2817_s2, %s2431_s19  ;;  %s42_s15 = int_to_ptr.vmem [resolvable:$true] %s41_s15 }
  0x25   :  { %p2435_p3 = scmp.lt.u32.totalorder %s2431_s19, %s2817_s2 }
  0x27   :  { %p2437_p4 = pnand %p2435_p3, %p2432_p2 }
  0x29   :  { %2440 = shalt.err (!%p2437_p4)
}
  0x2a   :  { %s2441_s24 = scalar_lea.vmem %s42_s15, 512  ;;  %p2446_p6 = scmp.lt.s32.totalorder %s42_s15, %s42_s15 }
  0x2b   :  { %p2442_p5 = scmp.ne.s32.totalorder %s42_s15, %s2441_s24  ;;  %p2447_p7 = scmp.lt.s32.totalorder %s2441_s24, %s2441_s24 }
  0x2d   :  { %p2448_p8 = por %p2447_p7, %p2446_p6 }
  0x2f   :  { %p2449_p9 = pnand %p2448_p8, %p2442_p5 }
  0x31   :  { %2452 = shalt.err (!%p2449_p9)
}
  0x32   :  { %47 = dma.hbm_to_vmem [thread:$0]  %s2817_s2, 512, %s42_s15, [#allocation6], %s2483_s27, %s2483_s27, %s2484_s28  }
  0x33   :  { %2475 = dma.done.wait [#allocation3], 256  }
  0x34   :  { %2476 = vsyncadd [#allocation3], 4294967040 }
  0x35   :  { %2477 = dma.done.wait [#allocation6], 1024  }
  0x36   :  { %2478 = vsyncadd [#allocation6], 4294966272  ;;  %vm70_vm0 = vcmask 261120   ;;  %v61_v0 = vld [vmem:[#allocation5] sm:$0xff]  ;;  %v62_v1 = vld [vmem:[#allocation5 + $0x8] sm:$0xff]  ;;  %v2486_v8 = vmov 0.0   ;;  %v152_v14 = vlaneseq }
  0x37   :  { %v63_v2 = vld [vmem:[#allocation5 + $0x10] sm:$0xff]  ;;  %v2328_v3 = vpack.c.bf16 %v62_v1, %v61_v0  ;;  %v64_v4 = vld [vmem:[#allocation5 + $0x18] sm:$0xff]  ;;  %2208 = vmatprep.subr.mxu1 %v2486_v8  ;;  %vm2487_vm1 = vmmov 0   ;;  %s2488_s2 = smov 120   ;;  %s2489_s25 = smov 96   ;;  %vm160_vm2 = vcmask 64512  }
  0x38   :  { %v59_v5 = vld [vmem:[#allocation2] sm:$0xff]  ;;  %v2332_v6 = vpack.c.bf16 %v64_v4, %v63_v2  ;;  %v60_v7 = vld [vmem:[#allocation2 + $0x8] sm:$0xff]  ;;  %2210 = vmatprep.mubr.msk.f32.mxu1 %vm2487_vm1, %v2486_v8  ;;  %s2490_s26 = smov 88   ;;  %v153_v15 = vshrl.u32 %v152_v14, 7  ;;  %v155_v16 = vand.u32 127, %v152_v14  ;;  %s2491_s29 = smov 56  }
  0x39   :  { %2205 = vmatprep.mubr.msk.f32.mxu0 %vm70_vm0, %v59_v5  ;;  %2329 = vmatprep.subr.bf16.mxu0 %v2328_v3  ;;  %s2492_s30 = smov 64   ;;  %s2493_s5 = smov 80   ;;  %v2626_v38 = vld [vmem:[#allocation7 + $0x8] sm:$0xff]  ;;  %v2638_v47 = vld [vmem:[#allocation7] sm:$0xff]  ;;  %v2676_v14 = vld [vmem:[#allocation7 + $0x10] sm:$0xff] }
  0x3a   :  { %2331 = vmatpush3.bf16.msra.mxu0 %v2328_v3  ;;  %vm2606_vm3 = vcmp.ge.s32.totalorder %v153_v15, %v155_v16  ;;  %s2494_s6 = smov 112   ;;  %s2495_s7 = smov 72  }
  0x3b   :  { %2333 = vmatprep.subr.bf16.mxu0 %v2332_v6  ;;  %s2496_s8 = smov 104   ;;  %s2497_s9 = smov 48  }
  0x3c   :  { %s2498_s10 = smov 40  }
  0x3e   :  { %2335 = vmatpush3.bf16.msra.mxu0 %v2332_v6 }
  0x3f   :  { %2218 = vmatprep.subr.mxu0 %v2486_v8 }
  0x41   :  { %2206 = vmatmul.mubr.msk.f32.vlgmr.msra.gmra.mrb[0].mxu0 %vm70_vm0, %v60_v7 }
  0x42   :  { %2220 = vmatprep.mubr.msk.f32.mxu0 %vm2487_vm1, %v2486_v8 }
 0x114   :  { %v2585_v9 = vpop.f32.mrb[0].mxu0 }
 0x115   :  { %v2587_v10 = vpop.f32.mrb[1].mxu0 }
 0x116   :  { %324 = vrot.lane.b32.xlu1 %v2587_v10, %s2488_s2  ;;  %158 = vrot.lane.b32.xlu0 %v2587_v10, %s2489_s25 }
 0x11a   :  { %326 = vrot.lane.b32.xlu0 %v2587_v10, %s2490_s26 }
 0x188   :  { %v159_v11 = vpop.permute.xlu0 %158  ;;  %v325_v13 = vpop.permute.xlu1 %324 }
 0x189   :  { %2209 = vmatpush3.xpose.msk.msra.mxu1 %vm160_vm2, %v159_v11 }
 0x18a   :  { %2213 = vmatprep.subr.mxu1 %v2486_v8 }
 0x18c   :  { %2211 = vmatmul.mubr.msk.f32.vlgmr.msra.gmra.mrb[0].mxu1 %vm160_vm2, %v2587_v10  ;;  %v327_v12 = vpop.permute.xlu0 %326 }
 0x18d   :  { %2219 = vmatpush3.xpose.msk.msra.mxu0 %vm160_vm2, %v327_v12  ;;  %2215 = vmatprep.mubr.msk.f32.mxu1 %vm2487_vm1, %v2486_v8 }
 0x18e   :  { %2228 = vmatprep.subr.mxu0 %v2486_v8 }
 0x190   :  { %2221 = vmatmul.mubr.msk.f32.vlgmr.msra.gmra.mrb[2].mxu0 %vm160_vm2, %v325_v13 }
 0x191   :  { %2230 = vmatprep.mubr.msk.f32.mxu0 %vm2487_vm1, %v2486_v8  ;;  %2229 = vmatpush3.msra.mxu0 %v2626_v38 }
 0x192   :  { %2238 = vmatprep.subr.mxu0 %v2486_v8 }
 0x25f   :  { %v231_v17 = vpop.f32.mrb[0].mxu1 }
 0x260   :  { %v235_v19 = vmul.f32 0.35355338, %v231_v17  ;;  %v2212_v20 = vpop.f32.mrb[1].mxu1 }
 0x262   :  { %v236_v21 = vsel %vm2606_vm3, %v235_v19, -1e+30 }
 0x263   :  { %v398_v22 = vpop.f32.mrb[2].mxu0  ;;  %v237_v23 = vsel %vm160_vm2, %v236_v21, -inf }
 0x264   :  { %v402_v24 = vmul.f32 0.35355338, %v398_v22  ;;  %238 = vmax.xlane.f32.xlu1 %v237_v23  ;;  %v2222_v25 = vpop.f32.mrb[3].mxu0 }
 0x266   :  { %v403_v26 = vsel %vm2606_vm3, %v402_v24, -1e+30 }
 0x267   :  { %v404_v27 = vsel %vm160_vm2, %v403_v26, -inf }
 0x268   :  { %405 = vmax.xlane.f32.xlu0 %v404_v27 }
 0x2f1   :  { %v239_v28 = vpop.xlane.xlu1 %238 }
 0x2f2   :  { %v240_v29 = vsub.f32 %v236_v21, %v239_v28 }
 0x2f4   :  { %v241_v30 = vmul.f32 1.442695, %v240_v29 }
 0x2f5   :  { %v406_v31 = vpop.xlane.xlu0 %405 }
 0x2f6   :  { %2355 = vpow2.f32 %v241_v30  ;;  %v407_v32 = vsub.f32 %v403_v26, %v406_v31 }
 0x2f8   :  { %v408_v33 = vmul.f32 1.442695, %v407_v32 }
 0x2fa   :  { %2357 = vpow2.f32 %v408_v33 }
 0x300   :  { %v2356_v34 = vpop.eup %2355 }
 0x301   :  { %v243_v35 = vsel %vm160_vm2, %v2356_v34, 0.0 }
 0x302   :  { %244 = vadd.xlane.f32.xlu0 %v243_v35 }
 0x304   :  { %v2358_v36 = vpop.eup %2357 }
 0x305   :  { %v410_v37 = vsel %vm160_vm2, %v2358_v36, 0.0 }
 0x306   :  { %411 = vadd.xlane.f32.xlu1 %v410_v37  ;;  %v2713_v37 = vld [vmem:[#allocation7 + $0x18] sm:$0xff] }
 0x317   :  { %415 = vrot.lane.b32.xlu1 %v2587_v10, %s2491_s29 }
 0x318   :  { %248 = vrot.lane.b32.xlu0 %v2587_v10, %s2492_s30 }
 0x31b   :  { %639 = vrot.lane.b32.xlu1 %v2587_v10, %s2493_s5 }
 0x31c   :  { %637 = vrot.lane.b32.xlu0 %v2587_v10, %s2494_s6 }
 0x38f   :  { %v245_v39 = vpop.xlane.xlu0 %244 }
 0x390   :  { %2359 = vrcp.f32 %v245_v39 }
 0x393   :  { %v412_v40 = vpop.xlane.xlu1 %411  ;;  %v249_v41 = vpop.permute.xlu0 %248 }
 0x394   :  { %2361 = vrcp.f32 %v412_v40  ;;  %2214 = vmatpush3.msra.mxu1 %v249_v41 }
 0x395   :  { %2223 = vmatprep.subr.mxu1 %v2486_v8 }
 0x397   :  { %v416_v44 = vpop.permute.xlu1 %415  ;;  %v638_v53 = vpop.permute.xlu0 %637 }
 0x39a   :  { %v2360_v42 = vpop.eup %2359 }
 0x39b   :  { %v247_v43 = vmul.f32 %v2360_v42, %v2356_v34  ;;  %v640_v51 = vpop.permute.xlu1 %639 }
 0x39d   :  { %2216 = vmatmul.mubr.msk.f32.vlgmr.msra.gmra.mrb[2].mxu1 %vm160_vm2, %v247_v43 }
 0x39e   :  { %v2362_v45 = vpop.eup %2361  ;;  %2224 = vmatpush3.msra.mxu1 %v416_v44  ;;  %2225 = vmatprep.mubr.msk.f32.mxu1 %vm2487_vm1, %v2486_v8 }
 0x39f   :  { %v414_v46 = vmul.f32 %v2362_v45, %v2358_v36  ;;  %2233 = vmatprep.subr.mxu1 %v2486_v8 }
 0x3a1   :  { %2226 = vmatmul.mubr.msk.f32.vlgmr.msra.gmra.mrb[4].mxu1 %vm160_vm2, %v414_v46 }
 0x3a2   :  { %2235 = vmatprep.mubr.msk.f32.mxu1 %vm2487_vm1, %v2486_v8  ;;  %2234 = vmatpush3.msra.mxu1 %v2638_v47 }
 0x3a3   :  { %2243 = vmatprep.subr.mxu1 %v2486_v8 }
 0x470   :  { %v320_v48 = vpop.f32.mrb[2].mxu1 }
 0x471   :  { %v2217_v49 = vpop.f32.mrb[3].mxu1  ;;  %2236 = vmatmul.mubr.msk.f32.vlgmr.msra.gmra.mrb[6].mxu1 %vm160_vm2, %v320_v48 }
 0x472   :  { %2245 = vmatprep.mubr.msk.f32.mxu1 %vm2487_vm1, %v2486_v8 }
 0x474   :  { %v487_v50 = vpop.f32.mrb[4].mxu1 }
 0x475   :  { %v2227_v52 = vpop.f32.mrb[5].mxu1  ;;  %2231 = vmatmul.mubr.msk.f32.vlgmr.msra.gmra.mrb[4].mxu0 %vm160_vm2, %v487_v50 }
 0x476   :  { %2239 = vmatpush3.xpose.msk.msra.mxu0 %vm160_vm2, %v640_v51  ;;  %2240 = vmatprep.mubr.msk.f32.mxu0 %vm2487_vm1, %v2486_v8 }
 0x477   :  { %2248 = vmatprep.subr.mxu0 %v2486_v8 }
 0x479   :  { %2241 = vmatmul.mubr.msk.f32.vlgmr.msra.gmra.mrb[6].mxu0 %vm160_vm2, %v638_v53 }
 0x47a   :  { %2250 = vmatprep.mubr.msk.f32.mxu0 %vm2487_vm1, %v2486_v8  ;;  %2249 = vmatpush3.msra.mxu0 %v2676_v14 }
 0x47b   :  { %2258 = vmatprep.subr.mxu0 %v2486_v8 }
 0x544   :  { %v633_v54 = vpop.f32.mrb[6].mxu1 }
 0x545   :  { %v2237_v55 = vpop.f32.mrb[7].mxu1 }
 0x548   :  { %v560_v56 = vpop.f32.mrb[4].mxu0 }
 0x549   :  { %v2653_v57 = vadd.f32 %v633_v54, %v560_v56  ;;  %v2232_v58 = vpop.f32.mrb[5].mxu0 }
 0x54c   :  { %v711_v59 = vpop.f32.mrb[6].mxu0 }
 0x54d   :  { %v715_v60 = vmul.f32 0.35355338, %v711_v59  ;;  %v2242_v61 = vpop.f32.mrb[7].mxu0 }
 0x54f   :  { %v716_v62 = vsel %vm2606_vm3, %v715_v60, -1e+30 }
 0x550   :  { %v717_v63 = vsel %vm160_vm2, %v716_v62, -inf }
 0x551   :  { %718 = vmax.xlane.f32.xlu1 %v717_v63 }
 0x562   :  { %880 = vrot.lane.b32.xlu1 %v2587_v10, %s2495_s7 }
 0x566   :  { %878 = vrot.lane.b32.xlu1 %v2587_v10, %s2496_s8 }
 0x56a   :  { %1128 = vrot.lane.b32.xlu1 %v2585_v9, %s2489_s25 }
 0x5de   :  { %v719_v0 = vpop.xlane.xlu1 %718 }
 0x5df   :  { %v720_v1 = vsub.f32 %v716_v62, %v719_v0  ;;  %v2740_v62 = vld [vmem:[%s2818_s3] ss:$0 sm:$0xff]  ;;  %s2499_s3 = smov [#allocation8]  }
 0x5e0   :  { %s2095_s1 = sshll.u32 %s2499_s3, 4  ;;  %s2096_s1 = int_to_ptr.vmem [resolvable:$true] %s2095_s1 }
 0x5e1   :  { %v721_v2 = vmul.f32 1.442695, %v720_v1  ;;  %s2453_s13 = scalar_lea.vmem %s2096_s1, 256  ;;  %p2458_p11 = scmp.lt.s32.totalorder %s2096_s1, %s2096_s1 }
 0x5e2   :  { %v881_v11 = vpop.permute.xlu1 %880  ;;  %p2454_p10 = scmp.ne.s32.totalorder %s2096_s1, %s2453_s13  ;;  %p2459_p12 = scmp.lt.s32.totalorder %s2453_s13, %s2453_s13 }
 0x5e3   :  { %2363 = vpow2.f32 %v721_v2 }
 0x5e4   :  { %p2460_p13 = por %p2459_p12, %p2458_p11 }
 0x5e6   :  { %v879_v13 = vpop.permute.xlu1 %878  ;;  %p2461_p0 = pnand %p2460_p13, %p2454_p10 }
 0x5ea   :  { %v1129_v31 = vpop.permute.xlu1 %1128 }
 0x5ed   :  { %v2364_v3 = vpop.eup %2363 }
 0x5ee   :  { %v723_v4 = vsel %vm160_vm2, %v2364_v3, 0.0 }
 0x5ef   :  { %724 = vadd.xlane.f32.xlu0 %v723_v4 }
 0x605   :  { %728 = vrot.lane.b32.xlu0 %v2587_v10, %s2497_s9 }
 0x67c   :  { %v725_v5 = vpop.xlane.xlu0 %724 }
 0x67d   :  { %2365 = vrcp.f32 %v725_v5 }
 0x680   :  { %v729_v6 = vpop.permute.xlu0 %728 }
 0x681   :  { %2244 = vmatpush3.msra.mxu1 %v729_v6 }
 0x682   :  { %2253 = vmatprep.subr.mxu1 %v2486_v8 }
 0x687   :  { %v2366_v7 = vpop.eup %2365 }
 0x688   :  { %v727_v12 = vmul.f32 %v2366_v7, %v2364_v3 }
 0x68a   :  { %2246 = vmatmul.mubr.msk.f32.vlgmr.msra.gmra.mrb[8].mxu1 %vm160_vm2, %v727_v12 }
 0x68b   :  { %2254 = vmatpush3.xpose.msk.msra.mxu1 %vm160_vm2, %v881_v11  ;;  %2255 = vmatprep.mubr.msk.f32.mxu1 %vm2487_vm1, %v2486_v8 }
 0x68c   :  { %2263 = vmatprep.subr.mxu1 %v2486_v8 }
 0x68e   :  { %2256 = vmatmul.mubr.msk.f32.vlgmr.msra.gmra.mrb[10].mxu1 %vm160_vm2, %v879_v13 }
 0x68f   :  { %2265 = vmatprep.mubr.msk.f32.mxu1 %vm2487_vm1, %v2486_v8  ;;  %2264 = vmatpush3.msra.mxu1 %v2713_v37 }
 0x690   :  { %2273 = vmatprep.subr.mxu1 %v2486_v8 }
 0x75d   :  { %v800_v15 = vpop.f32.mrb[8].mxu1 }
 0x75e   :  { %v2247_v16 = vpop.f32.mrb[9].mxu1  ;;  %2251 = vmatmul.mubr.msk.f32.vlgmr.msra.gmra.mrb[8].mxu0 %vm160_vm2, %v800_v15 }
 0x75f   :  { %2260 = vmatprep.mubr.msk.f32.mxu0 %vm2487_vm1, %v2486_v8 }
 0x761   :  { %v952_v17 = vpop.f32.mrb[10].mxu1 }
 0x762   :  { %v956_v19 = vmul.f32 0.35355338, %v952_v17  ;;  %v2257_v20 = vpop.f32.mrb[11].mxu1 }
 0x764   :  { %v957_v21 = vsel %vm2606_vm3, %v956_v19, -1e+30 }
 0x765   :  { %v958_v22 = vsel %vm160_vm2, %v957_v21, -inf }
 0x766   :  { %959 = vmax.xlane.f32.xlu0 %v958_v22 }
 0x77c   :  { %969 = vrot.lane.b32.xlu0 %v2587_v10, %s2498_s10 }
 0x780   :  { %1295 = vrot.lane.b32.xlu0 %v2585_v9, %s2490_s26 }
 0x7f3   :  { %v960_v23 = vpop.xlane.xlu0 %959 }
 0x7f4   :  { %v961_v24 = vsub.f32 %v957_v21, %v960_v23 }
 0x7f6   :  { %v962_v25 = vmul.f32 1.442695, %v961_v24 }
 0x7f7   :  { %v970_v26 = vpop.permute.xlu0 %969 }
 0x7f8   :  { %2367 = vpow2.f32 %v962_v25  ;;  %2259 = vmatpush3.msra.mxu0 %v970_v26 }
 0x7f9   :  { %2268 = vmatprep.subr.mxu0 %v2486_v8 }
 0x7fb   :  { %v1296_v35 = vpop.permute.xlu0 %1295 }
 0x802   :  { %v2368_v27 = vpop.eup %2367 }
 0x803   :  { %v964_v28 = vsel %vm160_vm2, %v2368_v27, 0.0 }
 0x804   :  { %965 = vadd.xlane.f32.xlu1 %v964_v28 }
 0x815   :  { %1293 = vrot.lane.b32.xlu1 %v2585_v9, %s2488_s2 }
 0x831   :  { %v873_v29 = vpop.f32.mrb[8].mxu0 }
 0x832   :  { %v2695_v10 = vadd.f32 %v873_v29, %v2653_v57  ;;  %v2252_v30 = vpop.f32.mrb[9].mxu0 }
 0x891   :  { %v966_v32 = vpop.xlane.xlu1 %965 }
 0x892   :  { %2369 = vrcp.f32 %v966_v32 }
 0x895   :  { %v1294_v36 = vpop.permute.xlu1 %1293 }
 0x89c   :  { %v2370_v33 = vpop.eup %2369 }
 0x89d   :  { %v968_v34 = vmul.f32 %v2370_v33, %v2368_v27 }
 0x89f   :  { %2261 = vmatmul.mubr.msk.f32.vlgmr.msra.gmra.mrb[10].mxu0 %vm160_vm2, %v968_v34 }
 0x8a0   :  { %2269 = vmatpush3.xpose.msk.msra.mxu0 %vm160_vm2, %v1129_v31  ;;  %2270 = vmatprep.mubr.msk.f32.mxu0 %vm2487_vm1, %v2486_v8 }
 0x8a1   :  { %2278 = vmatprep.subr.mxu0 %v2486_v8 }
 0x8a3   :  { %2271 = vmatmul.mubr.msk.f32.vlgmr.msra.gmra.mrb[12].mxu0 %vm160_vm2, %v2585_v9 }
 0x8a4   :  { %2279 = vmatpush3.xpose.msk.msra.mxu0 %vm160_vm2, %v1296_v35  ;;  %2280 = vmatprep.mubr.msk.f32.mxu0 %vm2487_vm1, %v2486_v8 }
 0x8a5   :  { %2288 = vmatprep.subr.mxu0 %v2486_v8 }
 0x8a7   :  { %2281 = vmatmul.mubr.msk.f32.vlgmr.msra.gmra.mrb[14].mxu0 %vm160_vm2, %v1294_v36 }
 0x8a8   :  { %2289 = vmatpush3.msra.mxu0 %v2626_v38  ;;  %2290 = vmatprep.mubr.msk.f32.mxu0 %vm2487_vm1, %v2486_v8 }
 0x8a9   :  { %2298 = vmatprep.subr.mxu0 %v2486_v8 }
 0x972   :  { %v1041_v39 = vpop.f32.mrb[10].mxu0 }
 0x973   :  { %v2262_v40 = vpop.f32.mrb[11].mxu0  ;;  %2266 = vmatmul.mubr.msk.f32.vlgmr.msra.gmra.mrb[12].mxu1 %vm160_vm2, %v1041_v39 }
 0x974   :  { %2275 = vmatprep.mubr.msk.f32.mxu1 %vm2487_vm1, %v2486_v8 }
 0x976   :  { %v1200_v41 = vpop.f32.mrb[12].mxu0 }
 0x977   :  { %v1204_v38 = vmul.f32 0.35355338, %v1200_v41  ;;  %v2272_v42 = vpop.f32.mrb[13].mxu0 }
 0x979   :  { %v1205_v43 = vsel %vm2606_vm3, %v1204_v38, -1e+30 }
 0x97a   :  { %v1367_v44 = vpop.f32.mrb[14].mxu0  ;;  %v1206_v45 = vsel %vm160_vm2, %v1205_v43, -inf }
 0x97b   :  { %v1371_v46 = vmul.f32 0.35355338, %v1367_v44  ;;  %1207 = vmax.xlane.f32.xlu0 %v1206_v45  ;;  %v2282_v48 = vpop.f32.mrb[15].mxu0 }
 0x97d   :  { %v1372_v49 = vsel %vm2606_vm3, %v1371_v46, -1e+30 }
 0x97e   :  { %v1373_v50 = vsel %vm160_vm2, %v1372_v49, -inf }
 0x97f   :  { %1374 = vmax.xlane.f32.xlu1 %v1373_v50 }
 0x990   :  { %1217 = vrot.lane.b32.xlu1 %v2585_v9, %s2492_s30 }
 0x994   :  { %1608 = vrot.lane.b32.xlu1 %v2585_v9, %s2493_s5 }
 0x998   :  { %1606 = vrot.lane.b32.xlu1 %v2585_v9, %s2494_s6 }
 0xa08   :  { %v1208_v51 = vpop.xlane.xlu0 %1207 }
 0xa09   :  { %v1209_v52 = vsub.f32 %v1205_v43, %v1208_v51 }
 0xa0b   :  { %v1210_v53 = vmul.f32 1.442695, %v1209_v52 }
 0xa0c   :  { %v1375_v54 = vpop.xlane.xlu1 %1374 }
 0xa0d   :  { %2371 = vpow2.f32 %v1210_v53  ;;  %v1376_v55 = vsub.f32 %v1372_v49, %v1375_v54 }
 0xa0f   :  { %v1377_v56 = vmul.f32 1.442695, %v1376_v55 }
 0xa10   :  { %v1218_v57 = vpop.permute.xlu1 %1217 }
 0xa11   :  { %2373 = vpow2.f32 %v1377_v56  ;;  %2274 = vmatpush3.msra.mxu1 %v1218_v57 }
 0xa12   :  { %2283 = vmatprep.subr.mxu1 %v2486_v8 }
 0xa14   :  { %v1609_v16 = vpop.permute.xlu1 %1608 }
 0xa17   :  { %v2372_v58 = vpop.eup %2371 }
 0xa18   :  { %v1212_v59 = vsel %vm160_vm2, %v2372_v58, 0.0 }
 0xa19   :  { %1213 = vadd.xlane.f32.xlu0 %v1212_v59 }
 0xa1b   :  { %v2374_v60 = vpop.eup %2373 }
 0xa1c   :  { %v1379_v61 = vsel %vm160_vm2, %v2374_v60, 0.0 }
 0xa1d   :  { %1380 = vadd.xlane.f32.xlu0 %v1379_v61 }
 0xa33   :  { %1384 = vrot.lane.b32.xlu0 %v2585_v9, %s2491_s29 }
 0xa46   :  { %v1114_v63 = vpop.f32.mrb[12].mxu1 }
 0xa47   :  { %v1118_v0 = vadd.f32 %v1114_v63, %v2695_v10  ;;  %v2267_v1 = vpop.f32.mrb[13].mxu1 }
 0xa49   :  { %v1125_v2 = vadd.f32 %v2740_v62, %v1118_v0 }
 0xa4b   :  { %1126 = vst.msk [vmem:[#allocation8] sm:$0xff] %vm70_vm0, %v1125_v2 }
 0xaa6   :  { %v1214_v3 = vpop.xlane.xlu0 %1213 }
 0xaa7   :  { %2375 = vrcp.f32 %v1214_v3 }
 0xaaa   :  { %v1381_v4 = vpop.xlane.xlu0 %1380 }
 0xaab   :  { %2377 = vrcp.f32 %v1381_v4 }
 0xaae   :  { %v1385_v7 = vpop.permute.xlu0 %1384 }
 0xab1   :  { %v2376_v5 = vpop.eup %2375 }
 0xab2   :  { %v1216_v6 = vmul.f32 %v2376_v5, %v2372_v58 }
 0xab4   :  { %2276 = vmatmul.mubr.msk.f32.vlgmr.msra.gmra.mrb[14].mxu1 %vm160_vm2, %v1216_v6 }
 0xab5   :  { %v2378_v11 = vpop.eup %2377  ;;  %2284 = vmatpush3.msra.mxu1 %v1385_v7  ;;  %2285 = vmatprep.mubr.msk.f32.mxu1 %vm2487_vm1, %v2486_v8 }
 0xab6   :  { %v1383_v12 = vmul.f32 %v2378_v11, %v2374_v60  ;;  %2293 = vmatprep.subr.mxu1 %v2486_v8 }
 0xab8   :  { %2286 = vmatmul.mubr.msk.f32.vlgmr.msra.gmra.mrb[16].mxu1 %vm160_vm2, %v1383_v12 }
 0xab9   :  { %2294 = vmatpush3.msra.mxu1 %v2638_v47  ;;  %2295 = vmatprep.mubr.msk.f32.mxu1 %vm2487_vm1, %v2486_v8  ;;  %v1607_v47 = vpop.permute.xlu1 %1606 }
 0xaba   :  { %2303 = vmatprep.subr.mxu1 %v2486_v8 }
 0xb87   :  { %v1289_v13 = vpop.f32.mrb[14].mxu1 }
 0xb88   :  { %v2277_v15 = vpop.f32.mrb[15].mxu1  ;;  %2296 = vmatmul.mubr.msk.f32.vlgmr.msra.gmra.mrb[18].mxu1 %vm160_vm2, %v1289_v13 }
 0xb89   :  { %2305 = vmatprep.mubr.msk.f32.mxu1 %vm2487_vm1, %v2486_v8 }
 0xb8b   :  { %v1456_v17 = vpop.f32.mrb[16].mxu1 }
 0xb8c   :  { %v2287_v19 = vpop.f32.mrb[17].mxu1  ;;  %2291 = vmatmul.mubr.msk.f32.vlgmr.msra.gmra.mrb[16].mxu0 %vm160_vm2, %v1456_v17 }
 0xb8d   :  { %2299 = vmatpush3.xpose.msk.msra.mxu0 %vm160_vm2, %v1609_v16  ;;  %2300 = vmatprep.mubr.msk.f32.mxu0 %vm2487_vm1, %v2486_v8 }
 0xb8e   :  { %2308 = vmatprep.subr.mxu0 %v2486_v8 }
 0xb90   :  { %2301 = vmatmul.mubr.msk.f32.vlgmr.msra.gmra.mrb[18].mxu0 %vm160_vm2, %v1607_v47 }
 0xb91   :  { %2309 = vmatpush3.msra.mxu0 %v2676_v14  ;;  %2310 = vmatprep.mubr.msk.f32.mxu0 %vm2487_vm1, %v2486_v8 }
 0xb92   :  { %2318 = vmatprep.subr.mxu0 %v2486_v8 }
 0xc5b   :  { %v1602_v20 = vpop.f32.mrb[18].mxu1 }
 0xc5c   :  { %v2297_v21 = vpop.f32.mrb[19].mxu1 }
 0xc5f   :  { %v1529_v22 = vpop.f32.mrb[16].mxu0 }
 0xc60   :  { %v1603_v23 = vadd.f32 %v1602_v20, %v1529_v22  ;;  %v2292_v24 = vpop.f32.mrb[17].mxu0 }
 0xc63   :  { %v1680_v25 = vpop.f32.mrb[18].mxu0 }
 0xc64   :  { %v1684_v26 = vmul.f32 0.35355338, %v1680_v25  ;;  %v2302_v27 = vpop.f32.mrb[19].mxu0 }
 0xc66   :  { %v1685_v28 = vsel %vm2606_vm3, %v1684_v26, -1e+30 }
 0xc67   :  { %v1686_v29 = vsel %vm160_vm2, %v1685_v28, -inf }
 0xc68   :  { %1687 = vmax.xlane.f32.xlu0 %v1686_v29 }
 0xc7e   :  { %1697 = vrot.lane.b32.xlu0 %v2585_v9, %s2497_s9 }
 0xc82   :  { %1847 = vrot.lane.b32.xlu0 %v2585_v9, %s2496_s8 }
 0xcf5   :  { %v1688_v14 = vpop.xlane.xlu0 %1687 }
 0xcf6   :  { %v1689_v10 = vsub.f32 %v1685_v28, %v1688_v14 }
 0xcf8   :  { %v1690_v30 = vmul.f32 1.442695, %v1689_v10 }
 0xcf9   :  { %v1698_v31 = vpop.permute.xlu0 %1697 }
 0xcfa   :  { %2379 = vpow2.f32 %v1690_v30  ;;  %2304 = vmatpush3.msra.mxu1 %v1698_v31 }
 0xcfb   :  { %2313 = vmatprep.subr.mxu1 %v2486_v8 }
 0xcfd   :  { %v1848_v40 = vpop.permute.xlu0 %1847 }
 0xd04   :  { %v2380_v32 = vpop.eup %2379 }
 0xd05   :  { %v1692_v33 = vsel %vm160_vm2, %v2380_v32, 0.0 }
 0xd06   :  { %1693 = vadd.xlane.f32.xlu1 %v1692_v33 }
 0xd17   :  { %1849 = vrot.lane.b32.xlu1 %v2585_v9, %s2495_s7 }
 0xd93   :  { %v1694_v34 = vpop.xlane.xlu1 %1693 }
 0xd94   :  { %2381 = vrcp.f32 %v1694_v34 }
 0xd97   :  { %v1850_v39 = vpop.permute.xlu1 %1849 }
 0xd9e   :  { %v2382_v35 = vpop.eup %2381 }
 0xd9f   :  { %v1696_v36 = vmul.f32 %v2382_v35, %v2380_v32 }
 0xda1   :  { %2306 = vmatmul.mubr.msk.f32.vlgmr.msra.gmra.mrb[20].mxu1 %vm160_vm2, %v1696_v36 }
 0xda2   :  { %2314 = vmatpush3.xpose.msk.msra.mxu1 %vm160_vm2, %v1850_v39  ;;  %2315 = vmatprep.mubr.msk.f32.mxu1 %vm2487_vm1, %v2486_v8 }
 0xda3   :  { %2323 = vmatprep.subr.mxu1 %v2486_v8 }
 0xda5   :  { %2316 = vmatmul.mubr.msk.f32.vlgmr.msra.gmra.mrb[22].mxu1 %vm160_vm2, %v1848_v40 }
 0xda6   :  { %2324 = vmatpush3.msra.mxu1 %v2713_v37  ;;  %2325 = vmatprep.mubr.msk.f32.mxu1 %vm2487_vm1, %v2486_v8 }
 0xe74   :  { %v1769_v41 = vpop.f32.mrb[20].mxu1 }
 0xe75   :  { %v2307_v38 = vpop.f32.mrb[21].mxu1  ;;  %2311 = vmatmul.mubr.msk.f32.vlgmr.msra.gmra.mrb[20].mxu0 %vm160_vm2, %v1769_v41 }
 0xe76   :  { %2320 = vmatprep.mubr.msk.f32.mxu0 %vm2487_vm1, %v2486_v8 }
 0xe78   :  { %v1921_v42 = vpop.f32.mrb[22].mxu1 }
 0xe79   :  { %v1925_v43 = vmul.f32 0.35355338, %v1921_v42  ;;  %v2317_v44 = vpop.f32.mrb[23].mxu1 }
 0xe7b   :  { %v1926_v45 = vsel %vm2606_vm3, %v1925_v43, -1e+30 }
 0xe7c   :  { %v1927_v46 = vsel %vm160_vm2, %v1926_v45, -inf }
 0xe7d   :  { %1928 = vmax.xlane.f32.xlu1 %v1927_v46 }
 0xf0a   :  { %v1929_v37 = vpop.xlane.xlu1 %1928 }
 0xf0b   :  { %v1930_v48 = vsub.f32 %v1926_v45, %v1929_v37 }
 0xf0d   :  { %v1931_v49 = vmul.f32 1.442695, %v1930_v48 }
 0xf0f   :  { %2383 = vpow2.f32 %v1931_v49 }
 0xf19   :  { %v2384_v50 = vpop.eup %2383 }
 0xf1a   :  { %v1933_v51 = vsel %vm160_vm2, %v2384_v50, 0.0 }
 0xf1b   :  { %1934 = vadd.xlane.f32.xlu0 %v1933_v51 }
 0xf31   :  { %1938 = vrot.lane.b32.xlu0 %v2585_v9, %s2498_s10 }
 0xf48   :  { %v1842_v8 = vpop.f32.mrb[20].mxu0 }
 0xf49   :  { %v1846_v52 = vadd.f32 %v1842_v8, %v1603_v23  ;;  %v2312_v53 = vpop.f32.mrb[21].mxu0 }
 0xfa8   :  { %v1935_v54 = vpop.xlane.xlu0 %1934 }
 0xfa9   :  { %2385 = vrcp.f32 %v1935_v54 }
 0xfac   :  { %v1939_v18 = vpop.permute.xlu0 %1938 }
 0xfad   :  { %2319 = vmatpush3.msra.mxu0 %v1939_v18 }
 0xfb3   :  { %v2386_v55 = vpop.eup %2385 }
 0xfb4   :  { %v1937_v56 = vmul.f32 %v2386_v55, %v2384_v50 }
 0xfb6   :  { %2321 = vmatmul.mubr.msk.f32.vlgmr.msra.gmra.mrb[22].mxu0 %vm160_vm2, %v1937_v56 }
0x1089   :  { %v2010_v57 = vpop.f32.mrb[22].mxu0 }
0x108a   :  { %v2322_v58 = vpop.f32.mrb[23].mxu0  ;;  %2326 = vmatmul.mubr.msk.f32.vlgmr.msra.gmra.mrb[24].mxu1 %vm160_vm2, %v2010_v57 }
0x115d   :  { %v2083_v59 = vpop.f32.mrb[24].mxu1 }
0x115e   :  { %v2087_v60 = vadd.f32 %v2083_v59, %v1846_v52  ;;  %v2327_v9 = vpop.f32.mrb[25].mxu1 }
0x1160   :  { %v2088_v61 = vadd.f32 %v2740_v62, %v2087_v60 }
0x1162   :  { %2089 = vst.msk [vmem:[#allocation8 + $0x8] sm:$0xff] %vm70_vm0, %v2088_v61 }
0x1163   :  { %2464 = shalt.err (!%p2461_p0)
}
0x1164   :  { %s2465_s16 = scalar_lea.hbm %s2819_s4, 256 }
0x1165   :  { %p2466_p1 = scmp.ne.s32.totalorder %s2819_s4, %s2465_s16  ;;  %p2469_p2 = scmp.lt.u32.totalorder %s2465_s16, %s2819_s4 }
0x1167   :  { %p2471_p3 = pnand %p2469_p2, %p2466_p1 }
0x1169   :  { %2474 = shalt.err (!%p2471_p3)
}
0x116a   :  { %2101 = dma.vmem_to_hbm [thread:$0]  %s2096_s1, 256, %s2819_s4, [#allocation4], %s2483_s27, %s2483_s27, %s2484_s28  }
0x116b   :  { %2479 = dma.done.wait [#allocation4], 256  }
0x116c   :  { %2480 = vsyncadd [#allocation4], 4294967040 }
0x116d   :  { %2105 = vsyncpa [#allocation3], 1 }
0x116e   :  { %2106 = vsyncpa [#allocation6], 1 }
0x116f   :  { %2107 = vsyncpa [#allocation4], 1 }

</bundles_post_ra>
